<compile_context>
chip_gen: v7x
topology: tpu7x:2x2x1
jax: 0.10.0
libtpu: 0.0.40
codegen_flags: <defaults>
</compile_context>

<pallas_src>
import functools

import jax
import jax.numpy as jnp
from jax.experimental import pallas as pl
from jax.experimental.pallas import tpu as pltpu


_LANES = 512                  # lane width of flattened slab (multiple of 128 and of 4)
_MAX_BLOCK_ELEMS = 1 << 20    # ~4 MiB f32 per block (double-buffered -> ~16 MiB live)


def _clip_kernel(boxes_ref, out_ref, *, width, height):
    """Clip one (rows, lanes) tile.  Coordinate id == lane % 4 by construction."""
    x = boxes_ref[...]
    lane = jax.lax.broadcasted_iota(jnp.int32, x.shape, x.ndim - 1) % 4
    # lane 0 (x1), 1 (y1): lower bound 0.  lane 2 (x2): upper W.  lane 3 (y2): upper H.
    lo = jnp.where(lane < 2, 0.0, -jnp.inf).astype(x.dtype)
    hi = jnp.where(lane == 2, width,
                   jnp.where(lane == 3, height, jnp.inf)).astype(x.dtype)
    out_ref[...] = jnp.minimum(jnp.maximum(x, lo), hi)


def clip_boxes(boxes, img):
    """JAX/Pallas equivalent of ClipBoxes.forward.

    boxes: (B, N, 4) float.  img: (B, C, H, W) -- only its static shape is used.
    Returns clipped boxes (B, N, 4).  (PyTorch mutates in place; here a new
    array with identical values is returned.)
    """
    B, N, four = boxes.shape
    assert four == 4, "boxes last dim must be 4"
    _, _, height, width = img.shape            # static Python ints
    dtype = boxes.dtype

    kernel = functools.partial(_clip_kernel, width=float(width), height=float(height))
    params = pltpu.CompilerParams(
        dimension_semantics=("parallel",),
        vmem_limit_bytes=32 * 1024 * 1024,
    )

    total = B * N * 4
    if total % _LANES == 0:
        # Preferred path: whole batch flattened into one lane-dense (rows, 512)
        # slab (free reshape, full (8,128) vreg occupancy, fewest grid steps).
        rows = total // _LANES
        flat = boxes.reshape(rows, _LANES)
        max_rows = max(8, (_MAX_BLOCK_ELEMS // _LANES) // 8 * 8)   # multiple of 8
        tile_rows = rows if rows <= max_rows else max_rows
        grid = (pl.cdiv(rows, tile_rows),)
        out = pl.pallas_call(
            kernel,
            out_shape=jax.ShapeDtypeStruct((rows, _LANES), dtype),
            grid=grid,
            in_specs=[pl.BlockSpec((tile_rows, _LANES), lambda i: (i, 0))],
            out_specs=pl.BlockSpec((tile_rows, _LANES), lambda i: (i, 0)),
            compiler_params=params,
        )(flat)
    else:
        # Fallback (B*N not a multiple of 128): batch on sublanes, tile the
        # lane-dense N*4 axis with tiles that are multiples of 128 (hence of 4).
        flat = boxes.reshape(B, N * 4)
        padded_b = -(-B // 8) * 8                      # sublane padding in VMEM
        lane_cap = max(128, (_MAX_BLOCK_ELEMS // padded_b) // 128 * 128)
        tile_lanes = N * 4 if N * 4 <= lane_cap else lane_cap
        grid = (pl.cdiv(N * 4, tile_lanes),)
        out = pl.pallas_call(
            kernel,
            out_shape=jax.ShapeDtypeStruct((B, N * 4), dtype),
            grid=grid,
            in_specs=[pl.BlockSpec((B, tile_lanes), lambda j: (0, j))],
            out_specs=pl.BlockSpec((B, tile_lanes), lambda j: (0, j)),
            compiler_params=params,
        )(flat)

    return out.reshape(B, N, 4)


def _clip_reference(boxes, img):
    _, _, height, width = img.shape
    x1 = jnp.maximum(boxes[:, :, 0], 0.0)
    y1 = jnp.maximum(boxes[:, :, 1], 0.0)
    x2 = jnp.minimum(boxes[:, :, 2], float(width))
    y2 = jnp.minimum(boxes[:, :, 3], float(height))
    return jnp.stack([x1, y1, x2, y2], axis=2)


if __name__ == "__main__":
    key = jax.random.PRNGKey(0)
    k1, k2 = jax.random.split(key, 2)

    # Main case: B=2, N=256 (B*N multiple of 128 -> dense slab path).
    B, N = 2, 256
    H, W = 64, 80
    img = jnp.zeros((B, 3, H, W), dtype=jnp.float32)
    # Boxes spread beyond [0, W] x [0, H] so every clamp actually triggers.
    boxes = jax.random.uniform(k1, (B, N, 4), dtype=jnp.float32,
                               minval=-30.0, maxval=130.0)

    out = jax.block_until_ready(clip_boxes(boxes, img))
    ref = _clip_reference(boxes, img)
    assert out.shape == (B, N, 4)
    assert jnp.allclose(out, ref, atol=0.0, rtol=0.0)

    # Fallback-path coverage: B*N not a multiple of 128.
    B2, N2 = 2, 100
    img2 = jnp.zeros((B2, 3, 48, 56), dtype=jnp.float32)
    boxes2 = jax.random.uniform(k2, (B2, N2, 4), dtype=jnp.float32,
                                minval=-30.0, maxval=130.0)
    out2 = jax.block_until_ready(clip_boxes(boxes2, img2))
    ref2 = _clip_reference(boxes2, img2)
    assert jnp.allclose(out2, ref2, atol=0.0, rtol=0.0)

    print("KERNEL_OK")
</pallas_src>

<mosaic_0001>
module attributes {stable_mosaic.version = 11 : i64} {
  func.func @_clip_kernel(%arg0: i32, %arg1: memref<4x512xf32, #tpu.memory_space<vmem>>, %arg2: memref<4x512xf32, #tpu.memory_space<vmem>>) attributes {dimension_semantics = [#tpu.dimension_semantics<parallel>], iteration_bounds = array<i64: 1>, scalar_prefetch = 0 : i64, scratch_operands = 0 : i64, tpu.core_type = #tpu.core_type<tc>, window_params = [{transform_indices = @transform_0, window_bounds = array<i64: 4, 512>}, {transform_indices = @transform_1, window_bounds = array<i64: 4, 512>}]} {
    %c0 = arith.constant 0 : index
    %c0_0 = arith.constant 0 : index
    %0 = vector.load %arg1[%c0, %c0_0] : memref<4x512xf32, #tpu.memory_space<vmem>>, vector<4x512xf32>
    %1 = tpu.iota {dimensions = array<i32: 1>} : vector<4x512xi32>
    %c4_i32 = arith.constant 4 : i32
    %c0_i32 = arith.constant 0 : i32
    %2 = arith.cmpi eq, %c4_i32, %c0_i32 : i32
    %c1_i32 = arith.constant 1 : i32
    %3 = arith.select %2, %c1_i32, %c4_i32 : i32
    %4 = vector.broadcast %3 : i32 to vector<4x512xi32>
    %5 = arith.remsi %1, %4 : vector<4x512xi32>
    %c0_i32_1 = arith.constant 0 : i32
    %6 = vector.broadcast %c0_i32_1 : i32 to vector<4x512xi32>
    %7 = arith.cmpi ne, %5, %6 : vector<4x512xi32>
    %c0_i32_2 = arith.constant 0 : i32
    %8 = vector.broadcast %c0_i32_2 : i32 to vector<4x512xi32>
    %9 = arith.cmpi slt, %5, %8 : vector<4x512xi32>
    %c0_i32_3 = arith.constant 0 : i32
    %10 = arith.cmpi slt, %3, %c0_i32_3 : i32
    %11 = vector.broadcast %10 : i1 to vector<4x512xi1>
    %12 = vector.broadcast %11 : vector<4x512xi1> to vector<4x512xi1>
    %13 = arith.xori %9, %12 : vector<4x512xi1>
    %14 = arith.andi %13, %7 : vector<4x512xi1>
    %15 = vector.broadcast %3 : i32 to vector<4x512xi32>
    %16 = arith.addi %5, %15 : vector<4x512xi32>
    %17 = arith.select %14, %16, %5 : vector<4x512xi1>, vector<4x512xi32>
    %c2_i32 = arith.constant 2 : i32
    %18 = vector.broadcast %c2_i32 : i32 to vector<4x512xi32>
    %19 = arith.cmpi slt, %17, %18 : vector<4x512xi32>
    %cst = arith.constant 0.000000e+00 : f32
    %cst_4 = arith.constant 0xFF800000 : f32
    %20 = vector.broadcast %cst : f32 to vector<4x512xf32>
    %21 = vector.broadcast %cst_4 : f32 to vector<4x512xf32>
    %22 = arith.select %19, %20, %21 : vector<4x512xi1>, vector<4x512xf32>
    %c2_i32_5 = arith.constant 2 : i32
    %23 = vector.broadcast %c2_i32_5 : i32 to vector<4x512xi32>
    %24 = arith.cmpi eq, %17, %23 : vector<4x512xi32>
    %c3_i32 = arith.constant 3 : i32
    %25 = vector.broadcast %c3_i32 : i32 to vector<4x512xi32>
    %26 = arith.cmpi eq, %17, %25 : vector<4x512xi32>
    %cst_6 = arith.constant 6.400000e+01 : f32
    %cst_7 = arith.constant 0x7F800000 : f32
    %27 = vector.broadcast %cst_6 : f32 to vector<4x512xf32>
    %28 = vector.broadcast %cst_7 : f32 to vector<4x512xf32>
    %29 = arith.select %26, %27, %28 : vector<4x512xi1>, vector<4x512xf32>
    %cst_8 = arith.constant 8.000000e+01 : f32
    %30 = vector.broadcast %cst_8 : f32 to vector<4x512xf32>
    %31 = arith.select %24, %30, %29 : vector<4x512xi1>, vector<4x512xf32>
    %32 = arith.maximumf %0, %22 : vector<4x512xf32>
    %33 = arith.minimumf %32, %31 : vector<4x512xf32>
    %c0_9 = arith.constant 0 : index
    %c0_10 = arith.constant 0 : index
    %34 = vector.load %arg2[%c0_9, %c0_10] : memref<4x512xf32, #tpu.memory_space<vmem>>, vector<4x512xf32>
    tpu.vector_store %arg2[%c0_9, %c0_10], %33 {strides = array<i32>} : memref<4x512xf32, #tpu.memory_space<vmem>>, vector<4x512xf32>,
    return
  }
  func.func @transform_0(%arg0: i32) -> (i32, i32) {
    %c0_i32 = arith.constant 0 : i32
    %c0_i32_0 = arith.constant 0 : i32
    return %arg0, %c0_i32 : i32, i32
  }
  func.func @transform_1(%arg0: i32) -> (i32, i32) {
    %c0_i32 = arith.constant 0 : i32
    %c0_i32_0 = arith.constant 0 : i32
    return %arg0, %c0_i32 : i32, i32
  }
}

</mosaic_0001>

<bundles_post_ra>
// kernel: tpu_custom_call.1
= control target key start
LH: loop header
LB: loop body
LE: loop exit
PB: predicated region body
PF: predicated region fallthrough
CT: control target
= control target key end

     0   :  { %6 = vsyncpa [#allocation3], 0  ;;  %s227_s0 = inlined_call_operand.hbm [shape: f32[4,512], index: 0, kind: input, shape index: {}]   ;;  %s228_s1 = inlined_call_operand.hbm [shape: f32[4,512], index: 1, kind: output, shape index: {}]  }
   0x1   :  { %7 = vsyncpa [#allocation4], 0  ;;  %s189_s6 = smov [#allocation2]   ;;  %s141_s10 = scalar_lea.hbm %s227_s0, 256 }
   0x2   :  { %s14_s7 = sshll.u32 %s189_s6, 4  ;;  %p142_p0 = scmp.ne.s32.totalorder %s227_s0, %s141_s10  ;;  %s15_s7 = int_to_ptr.vmem [resolvable:$true] %s14_s7 }
   0x3   :  { %p145_p1 = scmp.lt.u32.totalorder %s141_s10, %s227_s0 }
   0x5   :  { %p147_p2 = pnand %p145_p1, %p142_p0 }
   0x7   :  { %150 = shalt.err (!%p147_p2)
}
   0x8   :  { %s151_s15 = scalar_lea.vmem %s15_s7, 256  ;;  %p156_p4 = scmp.lt.s32.totalorder %s15_s7, %s15_s7 }
   0x9   :  { %p152_p3 = scmp.ne.s32.totalorder %s15_s7, %s151_s15  ;;  %p157_p5 = scmp.lt.s32.totalorder %s151_s15, %s151_s15 }
   0xb   :  { %p158_p6 = por %p157_p5, %p156_p4 }
   0xd   :  { %p159_p7 = pnand %p158_p6, %p152_p3 }
   0xf   :  { %162 = shalt.err (!%p159_p7)
}
  0x10   :  { %17 = dma.hbm_to_vmem [thread:$0]  %s227_s0, 256, %s15_s7, [#allocation3]  }
  0x11   :  { %185 = dma.done.wait [#allocation3], 256  }
  0x12   :  { %186 = vsyncadd [#allocation3], 4294967040  ;;  %v23_v0 = vlaneseq  ;;  %v190_v7 = vmov -inf   ;;  %v191_v9 = vmov inf   ;;  %v21_v14 = vld [vmem:[#allocation2] sm:$0xff]  ;;  %v22_v22 = vld [vmem:[#allocation2 + $0x8] sm:$0xff] }
  0x13   :  { %s192_s0 = smov [#allocation5]  }
  0x14   :  { %v24_v1 = vand.u32 127, %v23_v0  ;;  %s128_s18 = sshll.u32 %s192_s0, 4  ;;  %s129_s18 = int_to_ptr.vmem [resolvable:$true] %s128_s18 }
  0x15   :  { %s163_s19 = scalar_lea.vmem %s129_s18, 256  ;;  %p168_p9 = scmp.lt.s32.totalorder %s129_s18, %s129_s18 }
  0x16   :  { %v25_v2 = vadd.s32 128, %v24_v1  ;;  %v32_v3 = vand.u32 3, %v24_v1  ;;  %v26_v4 = vadd.s32 256, %v24_v1  ;;  %v27_v5 = vadd.s32 384, %v24_v1  ;;  %p164_p8 = scmp.ne.s32.totalorder %s129_s18, %s163_s19  ;;  %p169_p10 = scmp.lt.s32.totalorder %s163_s19, %s163_s19 }
  0x18   :  { %v39_v6 = vand.u32 3, %v25_v2  ;;  %vm76_vm0 = vcmp.lt.s32.totalorder %v32_v3, 2  ;;  %vm84_vm1 = vcmp.eq.s32.totalorder %v32_v3, 2  ;;  %vm88_vm2 = vcmp.eq.s32.totalorder %v32_v3, 3  ;;  %p170_p11 = por %p169_p10, %p168_p9 }
  0x19   :  { %v80_v8 = vsel %vm76_vm0, 0.0, %v190_v7  ;;  %v92_v10 = vsel %vm88_vm2, 64.0, %v191_v9  ;;  %v46_v11 = vand.u32 3, %v26_v4  ;;  %v53_v12 = vand.u32 3, %v27_v5 }
  0x1a   :  { %vm77_vm3 = vcmp.lt.s32.totalorder %v39_v6, 2  ;;  %vm85_vm4 = vcmp.eq.s32.totalorder %v39_v6, 2  ;;  %vm89_vm5 = vcmp.eq.s32.totalorder %v39_v6, 3  ;;  %v96_v13 = vsel %vm84_vm1, 80.0, %v92_v10  ;;  %p171_p12 = pnand %p170_p11, %p164_p8 }
  0x1b   :  { %v81_v15 = vsel %vm77_vm3, 0.0, %v190_v7  ;;  %v93_v16 = vsel %vm89_vm5, 64.0, %v191_v9  ;;  %vm78_vm6 = vcmp.lt.s32.totalorder %v46_v11, 2  ;;  %vm79_vm7 = vcmp.lt.s32.totalorder %v53_v12, 2 }
  0x1c   :  { %v97_v17 = vsel %vm85_vm4, 80.0, %v93_v16  ;;  %v104_v18 = vcombine.low %v80_v8, %v81_v15  ;;  %v82_v19 = vsel %vm78_vm6, 0.0, %v190_v7  ;;  %v83_v20 = vsel %vm79_vm7, 0.0, %v190_v7 }
  0x1d   :  { %v114_v21 = vcombine.low %v96_v13, %v97_v17  ;;  %vm86_vm8 = vcmp.eq.s32.totalorder %v46_v11, 2  ;;  %vm87_vm9 = vcmp.eq.s32.totalorder %v53_v12, 2  ;;  %vm90_vm10 = vcmp.eq.s32.totalorder %v46_v11, 3 }
  0x1e   :  { %v108_v23 = vmax.f32 %v21_v14, %v104_v18  ;;  %vm91_vm11 = vcmp.eq.s32.totalorder %v53_v12, 3  ;;  %v94_v24 = vsel %vm90_vm10, 64.0, %v191_v9  ;;  %v105_v25 = vcombine.low %v82_v19, %v83_v20 }
  0x1f   :  { %v95_v26 = vsel %vm91_vm11, 64.0, %v191_v9  ;;  %v98_v27 = vsel %vm86_vm8, 80.0, %v94_v24 }
  0x20   :  { %v118_v28 = vmin.f32 %v108_v23, %v114_v21  ;;  %v99_v29 = vsel %vm87_vm9, 80.0, %v95_v26  ;;  %v109_v30 = vmax.f32 %v22_v22, %v105_v25 }
  0x21   :  { %v115_v31 = vcombine.low %v98_v27, %v99_v29 }
  0x22   :  { %120 = vst [vmem:[#allocation5] sm:$0xff] %v118_v28 }
  0x23   :  { %v119_v32 = vmin.f32 %v109_v30, %v115_v31 }
  0x25   :  { %121 = vst [vmem:[#allocation5 + $0x8] sm:$0xff] %v119_v32 }
  0x26   :  { %174 = shalt.err (!%p171_p12)
}
  0x27   :  { %s175_s22 = scalar_lea.hbm %s228_s1, 256 }
  0x28   :  { %p176_p13 = scmp.ne.s32.totalorder %s228_s1, %s175_s22  ;;  %p179_p0 = scmp.lt.u32.totalorder %s175_s22, %s228_s1 }
  0x2a   :  { %p181_p1 = pnand %p179_p0, %p176_p13 }
  0x2c   :  { %184 = shalt.err (!%p181_p1)
}
  0x2d   :  { %131 = dma.vmem_to_hbm [thread:$0]  %s129_s18, 256, %s228_s1, [#allocation4]  }
  0x2e   :  { %187 = dma.done.wait [#allocation4], 256  }
  0x2f   :  { %188 = vsyncadd [#allocation4], 4294967040 }
  0x30   :  { %135 = vsyncpa [#allocation3], 1 }
  0x31   :  { %136 = vsyncpa [#allocation4], 1 }

</bundles_post_ra>
